<compile_context>
chip_gen: v7x
topology: tpu7x:2x2x1
jax: 0.10.0
libtpu: 0.0.40
codegen_flags: <defaults>
</compile_context>

<pallas_src>
import functools
from typing import Any, Dict, Optional

import jax
import jax.numpy as jnp
from jax.experimental import pallas as pl
from jax.experimental.pallas import tpu as pltpu


# ------------------------------- helpers ------------------------------------

def _round_up(x: int, m: int) -> int:
    return ((x + m - 1) // m) * m


def _pick_hw_tile(hw: int, hw_tile: Optional[int], max_tile: int = 2048):
    """Pick a lane-dense HW tile (multiple of 128) and the padded HW extent."""
    if hw_tile is not None:
        t = max(128, _round_up(hw_tile, 128))
    else:
        t = min(_round_up(hw, 128), max_tile)
    hwp = _round_up(hw, t)
    return t, hwp


# ----------------------------- Pallas kernel --------------------------------

def _mask_kernel(q_ref, f_ref, m_ref):
    # q_ref: (QP, C)   bf16  padded query / mask embeddings (same block each step)
    # f_ref: (C, T)    bf16  one image's pixel-feature tile (HW on the lane axis)
    # m_ref: (QP, T)   bf16  soft-mask tile (sublane/lane-dense)
    scores = jnp.dot(q_ref[...], f_ref[...],
                     preferred_element_type=jnp.float32)          # MXU, f32 acc
    # sigmoid in f32 (EUP path; v5e has no bf16 VPU/EUP), store bf16.
    m_ref[...] = jax.nn.sigmoid(scores).astype(m_ref.dtype)


@functools.partial(jax.jit, static_argnames=("q_valid", "t_hw", "hwp"))
def _pallas_generate_masks(q_pad_bf16, feats, *, q_valid, t_hw, hwp):
    """q_pad_bf16: (QP, C) bf16; feats: (B, C, H, W) f32 -> (B, q_valid, H, W) bf16."""
    B, C, H, W = feats.shape
    HW = H * W
    QP = q_pad_bf16.shape[0]

    f = feats.reshape(B, C, HW).astype(jnp.bfloat16)   # fused into the jit
    if hwp != HW:
        f = jnp.pad(f, ((0, 0), (0, 0), (0, hwp - HW)))
    n_hw = hwp // t_hw

    # Explicit VMEM budget: double-buffered bf16 blocks + f32 scores temp + slack.
    q_bytes = QP * C * 2
    f_bytes = C * t_hw * 2
    m_bytes = QP * t_hw * 2
    scores_bytes = QP * t_hw * 4
    vmem_limit = int(min(96 << 20,
                         max(16 << 20,
                             2 * (q_bytes + f_bytes + m_bytes)
                             + 2 * scores_bytes + (4 << 20))))

    cost = pl.CostEstimate(
        flops=2 * B * QP * C * hwp,
        transcendentals=B * QP * hwp,                         # exp inside sigmoid
        bytes_accessed=2 * (QP * C + B * C * hwp + B * QP * hwp),
    )

    masks = pl.pallas_call(
        _mask_kernel,
        out_shape=jax.ShapeDtypeStruct((B, QP, hwp), jnp.bfloat16),
        grid=(B, n_hw),
        in_specs=[
            pl.BlockSpec((QP, C), lambda b, h: (0, 0)),            # shared queries
            pl.BlockSpec((None, C, t_hw), lambda b, h: (b, 0, h)),  # feature tile
        ],
        out_specs=pl.BlockSpec((None, QP, t_hw), lambda b, h: (b, 0, h)),
        compiler_params=pltpu.CompilerParams(
            dimension_semantics=("parallel", "parallel"),   # megacore on v7x
            vmem_limit_bytes=vmem_limit,
        ),
        cost_estimate=cost,
    )(q_pad_bf16, f)

    # Drop padded query rows / padded HW lanes before handing masks downstream.
    return masks[:, :q_valid, :HW].reshape(B, q_valid, H, W)


# -------------------------- module-level glue code ---------------------------

class PaddedList:
    """Minimal stand-in for the PaddedList container used by BaseSegmentor."""

    def __init__(self, features):
        self.features = features          # (B, C, H, W)
        self.padded_masks = None
        self.unpadded_masks = None

    def set_padded_masks(self, masks):
        self.padded_masks = masks

    def set_unpadded_masks(self, masks):
        self.unpadded_masks = masks


class PallasSegmentor:
    """Concrete BaseSegmentor with the hot path (matmul + sigmoid) in Pallas."""

    def __init__(self, num_queries, feat_dim, num_classes,
                 mask_is_padded=True, hw_tile: Optional[int] = None):
        self._mask_is_padded = mask_is_padded
        self._hw_tile = hw_tile
        self._num_queries = num_queries
        # Deterministic parameter init (synthetic weights, no checkpoint).
        kq, kc = jax.random.split(jax.random.PRNGKey(42))
        self.query_embed = (jax.random.normal(kq, (num_queries, feat_dim),
                                              dtype=jnp.float32) * 0.02)
        self.class_proj = (jax.random.normal(kc, (feat_dim, num_classes),
                                             dtype=jnp.float32) * 0.02)

        # ---- hoisted constant work (review: don't redo per forward) ----
        q_bf16 = self.query_embed.astype(jnp.bfloat16)
        w_bf16 = self.class_proj.astype(jnp.bfloat16)
        qp = max(16, _round_up(num_queries, 16))      # bf16 sublane-dense Q pad
        self._q_pad_bf16 = (jnp.zeros((qp, feat_dim), jnp.bfloat16)
                            .at[:num_queries].set(q_bf16))
        # Class logits depend only on parameters (image-independent): compute
        # once here instead of inside every HW grid step of the kernel.
        self._class_logits = jnp.dot(q_bf16, w_bf16,
                                     preferred_element_type=jnp.float32)  # (Q, K)

    def is_closed_classifier(self) -> bool:
        return True

    def generate_masks(self, batched_inputs: Dict[str, Any],
                       encode_dict: Dict[str, Any]):
        input_f: PaddedList = encode_dict['input_f']
        feats = input_f.features                         # (B, C, H, W)  NCHW
        B, C, H, W = feats.shape
        t_hw, hwp = _pick_hw_tile(H * W, self._hw_tile)
        pred_masks = _pallas_generate_masks(
            self._q_pad_bf16, feats,
            q_valid=self._num_queries, t_hw=t_hw, hwp=hwp)       # (B, Q, H, W)
        # Logits are query-conditioned only (identical per image): broadcast at
        # the consumer to satisfy the "List B of (Q, K)" contract.
        pred_logits = jnp.broadcast_to(self._class_logits[None],
                                       (B,) + self._class_logits.shape)
        return pred_masks, pred_logits

    def forward(self, batched_inputs, encode_dict):
        pred_masks, pred_logits = self.generate_masks(batched_inputs, encode_dict)
        input_f: PaddedList = encode_dict['input_f']
        if self._mask_is_padded:
            input_f.set_padded_masks(pred_masks)
        else:
            input_f.set_unpadded_masks(pred_masks)
        return pred_logits

    __call__ = forward


# --------------------------------- driver ------------------------------------

if __name__ == "__main__":
    B, C, H, W = 2, 32, 16, 16      # batch, feat channels, spatial
    Q, K = 8, 16                    # queries, classes

    key = jax.random.PRNGKey(0)
    feats = jax.random.normal(key, (B, C, H, W), dtype=jnp.float32)

    input_f = PaddedList(feats)
    encode_dict = {"input_f": input_f}
    batched_inputs = [{} for _ in range(B)]

    # hw_tile=128 forces a real (B=2, HW=2) grid even at this toy spatial size,
    # exercising the pipelined/tiled path; leave hw_tile=None for production.
    segmentor = PallasSegmentor(num_queries=Q, feat_dim=C, num_classes=K,
                                mask_is_padded=True, hw_tile=128)
    pred_logits = segmentor(batched_inputs, encode_dict)

    pred_logits = jax.block_until_ready(pred_logits)
    masks = jax.block_until_ready(input_f.padded_masks)

    # Reference check in plain JAX (same bf16 input rounding as the kernel,
    # f32 accumulation / sigmoid).
    q32 = segmentor.query_embed.astype(jnp.bfloat16).astype(jnp.float32)
    f32f = feats.astype(jnp.bfloat16).astype(jnp.float32)
    w32 = segmentor.class_proj.astype(jnp.bfloat16).astype(jnp.float32)
    ref_masks = jax.nn.sigmoid(jnp.einsum("qc,bchw->bqhw", q32, f32f))
    ref_logits = jnp.broadcast_to((q32 @ w32)[None], (B, Q, K))

    assert masks.shape == (B, Q, H, W)
    assert masks.dtype == jnp.bfloat16
    assert pred_logits.shape == (B, Q, K)
    assert jnp.allclose(masks.astype(jnp.float32), ref_masks, atol=1e-2)
    assert jnp.allclose(pred_logits, ref_logits, atol=1e-3)

    print("KERNEL_OK")
</pallas_src>

<mosaic_0001>
module attributes {stable_mosaic.version = 11 : i64} {
  func.func @_mask_kernel(%arg0: i32, %arg1: i32, %arg2: memref<16x32xbf16, #tpu.memory_space<vmem>>, %arg3: memref<1x32x128xbf16, #tpu.memory_space<vmem>>, %arg4: memref<1x16x128xbf16, #tpu.memory_space<vmem>>) attributes {dimension_semantics = [#tpu.dimension_semantics<parallel>, #tpu.dimension_semantics<parallel>], iteration_bounds = array<i64: 2, 2>, scalar_prefetch = 0 : i64, scratch_operands = 0 : i64, tpu.core_type = #tpu.core_type<tc>, window_params = [{pipeline_mode = #tpu.pipeline_mode<synchronous>, transform_indices = @transform_0, window_bounds = array<i64: 16, 32>}, {transform_indices = @transform_1, window_bounds = array<i64: 1, 32, 128>}, {transform_indices = @transform_2, window_bounds = array<i64: 1, 16, 128>}]} {
    %c0 = arith.constant 0 : index
    %c0_0 = arith.constant 0 : index
    %0 = vector.load %arg2[%c0, %c0_0] : memref<16x32xbf16, #tpu.memory_space<vmem>>, vector<16x32xbf16>
    %c0_1 = arith.constant 0 : index
    %c0_2 = arith.constant 0 : index
    %c0_3 = arith.constant 0 : index
    %1 = vector.load %arg3[%c0_1, %c0_2, %c0_3] : memref<1x32x128xbf16, #tpu.memory_space<vmem>>, vector<1x32x128xbf16>
    %2 = vector.shape_cast %1 : vector<1x32x128xbf16> to vector<32x128xbf16>
    %cst = arith.constant dense<0.000000e+00> : vector<16x128xf32>
    %3 = tpu.matmul %0, %2, %cst {dimension_numbers = #tpu.dot_dimension_numbers<[1], [0], [0], [1], [0, 0, 1, 1], [], []>} : vector<16x32xbf16>, vector<32x128xbf16>, vector<16x128xf32> -> vector<16x128xf32>
    %4 = arith.negf %3 : vector<16x128xf32>
    %5 = math.exp %4 : vector<16x128xf32>
    %cst_4 = arith.constant 1.000000e+00 : f32
    %6 = vector.broadcast %cst_4 : f32 to vector<16x128xf32>
    %7 = arith.addf %6, %5 : vector<16x128xf32>
    %8 = arith.divf %6, %7 : vector<16x128xf32>
    %9 = arith.truncf %8 : vector<16x128xf32> to vector<16x128xbf16>
    %c0_5 = arith.constant 0 : index
    %c0_6 = arith.constant 0 : index
    %c0_7 = arith.constant 0 : index
    %10 = vector.load %arg4[%c0_5, %c0_6, %c0_7] : memref<1x16x128xbf16, #tpu.memory_space<vmem>>, vector<1x16x128xbf16>
    %11 = vector.shape_cast %10 : vector<1x16x128xbf16> to vector<16x128xbf16>
    %12 = vector.shape_cast %9 : vector<16x128xbf16> to vector<1x16x128xbf16>
    tpu.vector_store %arg4[%c0_5, %c0_6, %c0_7], %12 {strides = array<i32>} : memref<1x16x128xbf16, #tpu.memory_space<vmem>>, vector<1x16x128xbf16>,
    return
  }
  func.func @transform_0(%arg0: i32, %arg1: i32) -> (i32, i32) {
    %c0_i32 = arith.constant 0 : i32
    %c0_i32_0 = arith.constant 0 : i32
    %c0_i32_1 = arith.constant 0 : i32
    return %c0_i32, %c0_i32_0 : i32, i32
  }
  func.func @transform_1(%arg0: i32, %arg1: i32) -> (i32, i32, i32) {
    %c0_i32 = arith.constant 0 : i32
    %c0_i32_0 = arith.constant 0 : i32
    return %arg0, %c0_i32, %arg1 : i32, i32, i32
  }
  func.func @transform_2(%arg0: i32, %arg1: i32) -> (i32, i32, i32) {
    %c0_i32 = arith.constant 0 : i32
    %c0_i32_0 = arith.constant 0 : i32
    return %arg0, %c0_i32, %arg1 : i32, i32, i32
  }
}

</mosaic_0001>

<bundles_post_ra>
// kernel: _pallas_generate_masks.1
= control target key start
LH: loop header
LB: loop body
LE: loop exit
PB: predicated region body
PF: predicated region fallthrough
CT: control target
= control target key end

     0   :  { %s609_s9 = smov 0   ;;  %s611_s10 = smov 0   ;;  %s708_s0 = inlined_call_operand.vmem [shape: bf16[16,32], index: 0, kind: input, shape index: {}]   ;;  %s709_s1 = inlined_call_operand.vmem [shape: bf16[2,32,256], index: 1, kind: input, shape index: {}]   ;;  %s710_s2 = inlined_call_operand.vmem [shape: bf16[2,16,256], index: 2, kind: output, shape index: {}]  }
   0x1   :  { %s613_s11 = smov 0   ;;  %s615_s12 = smov 0  }
   0x2   :  { %s617_s13 = smov 0   ;;  %s619_s14 = smov 0  }
   0x3   :  { %s621_s15 = smov 0  }
   0x4 LB: > { %s21_s16 = sadd.s32 1, %s582_s13  ;;  %s24_s17 = sadd.s32 1, %s586_s14  ;;  %s590_s15 = sphi %s621_s15, %s12_s15   ;;  %s586_s14 = sphi %s619_s14, %s717_s14   ;;  %s582_s13 = sphi %s617_s13, %s716_s13   ;;  %s578_s12 = sphi %s615_s12, %s715_s12   ;;  %s574_s11 = sphi %s613_s11, %s714_s11   ;;  %s570_s10 = sphi %s611_s10, %s713_s10   ;;  %s566_s9 = sphi %s609_s9, %s712_s9  }
   0x5   : > { %p22_p0 = scmp.ge.s32.totalorder %s21_s16, 2  ;;  %s426_s18 = sadd.s32 4294967295, %s590_s15  }
   0x6   : > { %p61_p1 = scmp.ne.s32.totalorder %s570_s10, %s566_s9  ;;  %p62_p2 = scmp.eq.s32.totalorder %s590_s15, 0 }
   0x7   : > { %s719_s16 = smov (%p22_p0, %s21_s16), 0  ;;  %s721_s17 = smov (!%p22_p0, %s24_s17), %s586_s14 }
   0x8   : > { %p26_p3 = scmp.ge.s32.totalorder %s721_s17, 2  ;;  %p93_p4 = scmp.eq.s32.totalorder %s426_s18, 3 }
   0x9   : > { %s50_s19 = ssub.s32 %s582_s13, %s719_s16  ;;  %p63_p5 = por %p62_p2, %p61_p1 }
   0xa   : > { %s723_s17 = smov (%p26_p3, %s721_s17), 0  ;;  %p657_p6 = por %p93_p4, %p61_p1 }
   0xb   : > { %s49_s21 = ssub.s32 %s586_s14, %s723_s17  ;;  %s54_s23 = sadd.s32 1, %s570_s10 }
   0xc   : > { %s51_s22 = sor.u32 %s50_s19, %s49_s21  ;;  %p429_p8 = scmp.ge.s32.totalorder %s590_s15, 4 }
   0xd   : > { %p52_p7 = scmp.eq.s32.totalorder %s51_s22, 0 }
   0xe   : > { %118 = sbr.rel (%p429_p8) target bundleno = 29 (0x1d), region = 20 }
   0xf   : > { %s665_s24 = scalar_select %p52_p7, %s570_s10, %s54_s23  }
  0x15   : > { %121 = sbr.rel (!%p63_p5) target bundleno = 29 (0x1d), region = 24  ;;  %s123_s25 = sand.u32 (%p63_p5), 1, %s570_s10  }
  0x16   : > { %s431_s26 = sshll.u32 (%p63_p5), %s586_s14, 3  ;;  %s430_s27 = sshll.u32 (%p63_p5), %s123_s25, 4 }
  0x17   : > { %s127_s28 = sadd.s32 (%p63_p5), %s582_s13, %s431_s26  ;;  %s125_s5 = scalar_lea.vmem (%p63_p5), [#allocation2], %s430_s27 }
  0x18   : > { %s432_s29 = sshll.u32 (%p63_p5), %s127_s28, 2 }
  0x19   : > { %s129_s4 = scalar_lea.vmem (%p63_p5), %s709_s1, %s432_s29 }
  0x1a   : > { %v145_v0 = vld [vmem:[%s129_s4] sm:$0xf] (%p63_p5)  ;;  %v147_v1 = vld [vmem:[%s129_s4 + $0x8] sm:$0xf] (%p63_p5)  ;;  %v149_v2 = vld [vmem:[%s129_s4 + $0x10] sm:$0xf] (%p63_p5) }
  0x1b   : > { %146 = vst [vmem:[%s125_s5] sm:$0xf] (%p63_p5), %v145_v0  ;;  %148 = vst [vmem:[%s125_s5 + $0x4] sm:$0xf] (%p63_p5), %v147_v1  ;;  %v151_v3 = vld [vmem:[%s129_s4 + $0x18] sm:$0xf] (%p63_p5) }
  0x1c   : > { %150 = vst [vmem:[%s125_s5 + $0x8] sm:$0xf] %v149_v2  ;;  %152 = vst [vmem:[%s125_s5 + $0xc] sm:$0xf] %v151_v3 }
  0x1d PF: > { %p433_p9 = scmp.ge.s32.totalorder %s590_s15, 1  ;;  %p182_p10 = scmp.lt.s32.totalorder %s590_s15, 5 }
  0x1f   : > { %p183_p11 = pnand %p433_p9, %p182_p10 }
  0x20   : > { %s189_s6 = sand.u32 (!%p183_p11), 1, %s566_s9   ;;  %v592_v4 = vmov (!%p183_p11), 0.0   ;;  %vm593_vm0 = vmmov (!%p183_p11), 0   ;;  %v527_v7 = vld [vmem:[%s708_s0] sm:$0xff] (!%p183_p11)   ;;  %vm233_vm1 = vcmask (!%p183_p11), 261120  }
  0x21   : > { %186 = sbr.rel (%p183_p11) target bundleno = 294 (0x126), region = 65  ;;  %459 = vmatprep.subr.bf16.mxu0 (!%p183_p11), %v592_v4  ;;  %s434_s7 = sshll.u32 (!%p183_p11), %s189_s6, 4  ;;  %463 = vmatprep.mubr.msk.bf16.mxu0 (!%p183_p11), %vm593_vm0, %v592_v4 }
  0x22   : > { %s191_s8 = scalar_lea.vmem (!%p183_p11), [#allocation2], %s434_s7  ;;  %s435_s9 = sshll.u32 (!%p183_p11), %s189_s6, 3 }
  0x23   : > { %v525_v5 = vld [vmem:[%s191_s8] sm:$0xff] (!%p183_p11)   ;;  %v526_v6 = vld [vmem:[%s191_s8 + $0x8] sm:$0xff] (!%p183_p11)   ;;  %s208_s21 = scalar_lea.vmem (!%p183_p11), [#allocation3], %s435_s9 }
  0x24   : > { %460 = vmatpush3.bf16.msra.mxu0 (!%p183_p11), %v525_v5 }
  0x25   : > { %461 = vmatprep.subr.bf16.mxu0 (!%p183_p11), %v592_v4 }
  0x28   : > { %462 = vmatpush3.bf16.msra.mxu0 %v526_v6  ;;  %s445_s22 = sshll.u32 (%p657_p6), %s578_s12, 2 }
  0x29   : > { %s308_s23 = sadd.s32 (%p657_p6), %s574_s11, %s445_s22 }
  0x2a   : > { %s446_s25 = sshll.u32 (%p657_p6), %s308_s23, 2 }
  0x2b   : > { %464 = vmatmul.mubr.msk.bf16.vlgmr.msra.gmra.mrb[0].mxu0 %vm233_vm1, %v527_v7  ;;  %s310_s28 = scalar_lea.vmem (%p657_p6), %s710_s2, %s446_s25 }
  0xfe   : > { %v271_v8 = vpop.f32.mrb[0].mxu0 }
  0xff   : > { %v440_v9 = vmul.f32 -1.442695, %v271_v8  ;;  %v465_v10 = vpop.f32.mrb[1].mxu0 }
 0x100   : > { %v274_v11 = vpop.f32.mrb[2].mxu0 }
 0x101   : > { %528 = vpow2.f32 %v440_v9  ;;  %v441_v12 = vmul.f32 -1.442695, %v274_v11  ;;  %v466_v13 = vpop.f32.mrb[3].mxu0 }
 0x103   : > { %530 = vpow2.f32 %v441_v12 }
 0x10b   : > { %v529_v14 = vpop.eup %528 }
 0x10c   : > { %v284_v15 = vadd.f32 1.0, %v529_v14 }
 0x10d   : > { %v531_v16 = vpop.eup %530 }
 0x10e   : > { %v285_v17 = vadd.f32 1.0, %v531_v16  ;;  %532 = vrcp.f32 %v284_v15 }
 0x110   : > { %534 = vrcp.f32 %v285_v17 }
 0x117   : > { %306 = sbr.rel (!%p657_p6) target bundleno = 294 (0x126), region = 73 }
 0x118   : > { %v533_v18 = vpop.eup %532 }
 0x11a   : > { %v535_v19 = vpop.eup %534 }
 0x11b   : > { %v454_v20 = vpack.c.bf16 %v535_v19, %v533_v18 }
 0x11d   : > { %455 = vst [vmem:[%s208_s21] sm:$0xff] %v454_v20  }
 0x124   : > { %v326_v21 = vld [vmem:[%s208_s21] sm:$0xf]  ;;  %v328_v22 = vld [vmem:[%s208_s21 + $0x4] sm:$0xf] }
 0x125   : > { %327 = vst [vmem:[%s310_s28] sm:$0xf] %v326_v21  ;;  %329 = vst [vmem:[%s310_s28 + $0x8] sm:$0xf] %v328_v22 }
 0x126 PF: > { %s12_s15 = sadd.s32 1, %s590_s15   ;;  %s712_s9 = smov %s570_s10 }
 0x127   : > { %p9_p12 = scmp.ge.s32.totalorder %s12_s15, 6   ;;  %s713_s10 = smov %s665_s24 }
 0x128   : > { %s714_s11 = smov %s582_s13  ;;  %s715_s12 = smov %s586_s14 }
 0x129   : > { %s716_s13 = smov %s719_s16  ;;  %s717_s14 = smov %s723_s17 }
 0x12a   :  { %11 = sbr.rel (!%p9_p12) target bundleno = 4 (0x4), region = 145 }

</bundles_post_ra>
